<compile_context>
chip_gen: v7x
topology: tpu7x:2x2x1
jax: 0.10.0
libtpu: 0.0.40
codegen_flags: <defaults>
</compile_context>

<pallas_src>
import functools

import jax
import jax.numpy as jnp
from jax import lax
from jax.experimental import pallas as pl
from jax.experimental.pallas import tpu as pltpu

EPS = 1e-5
NEG_SLOPE = 0.01
LANE = 128


def _round_up(x, m):
    return ((x + m - 1) // m) * m


def _sublane(dtype):
    # Sublane multiple for clean tiling: 8 for 4-byte dtypes, 16 for 2-byte dtypes.
    return 8 * (4 // jnp.dtype(dtype).itemsize)


# --------------------------------------------------------------------------- kernels


def _conv_stats_kernel(x_ref, halo_ref, w_ref, mask_ref, conv_ref, stats_ref,
                       slab_ref, *, tap_offsets, tile_m):
    """Pass 1: halo'd shifted-tap conv matmul + per-tile partial (sum, sum_sq)."""
    # Assemble the halo'd input slab in VMEM (both stores are lane-aligned).
    slab_ref[:, :tile_m] = x_ref[...]
    slab_ref[:, tile_m:] = halo_ref[...]
    slab = slab_ref[...]                               # (cin_pad, tile_m + halo_w)

    # KH*KW shifted taps: each a small (Cout, Cin) @ (Cin, tile_m) MXU matmul, f32 acc.
    acc = None
    for t, d in enumerate(tap_offsets):
        tap = slab[:, d:d + tile_m]                    # static lane-offset value slice
        part = jnp.dot(w_ref[t], tap, preferred_element_type=jnp.float32)
        acc = part if acc is None else acc + part

    conv_ref[...] = acc.astype(conv_ref.dtype)

    # Per-tile partial BN statistics over *valid* output positions only (f32).
    msk = mask_ref[...].astype(jnp.float32)            # (1, tile_m), 0/1
    cm = acc * msk
    s1 = jnp.sum(cm, axis=1, keepdims=True)            # (cout_pad, 1)
    s2 = jnp.sum(cm * acc, axis=1, keepdims=True)      # sum of conv^2 over valid lanes
    stats_ref[0] = jnp.concatenate([s1, s2], axis=1)   # (cout_pad, 2)


def _bn_lrelu_kernel(conv_ref, scale_ref, shift_ref, out_ref):
    """Pass 2: folded BN affine + LeakyReLU, lane-dense elementwise (f32 math)."""
    y = conv_ref[...].astype(jnp.float32) * scale_ref[...] + shift_ref[...]
    out_ref[...] = jnp.where(y >= 0, y, NEG_SLOPE * y)


# --------------------------------------------------------------------------- wrapper


def _pick_tile_m(m_needed, halo_w, cin_pad, cout_pad, in_bytes, conv_bytes,
                 vmem_budget_bytes=14 << 20):
    # Streamed bytes per lane column in pass 1 (the fatter pass): double-buffered
    # input block + mask + conv output, plus single-buffered slab scratch and f32 acc.
    per_col = (2 * (cin_pad * in_bytes + in_bytes + cout_pad * conv_bytes)
               + cin_pad * in_bytes + cout_pad * 4)
    t = vmem_budget_bytes // max(per_col, 1)
    t = min(int(t), 4096)                               # review: target 512-4096 lanes
    t = max(halo_w, (t // halo_w) * halo_w)
    return int(min(t, _round_up(m_needed, halo_w)))


def cbr_forward(x_nchw, conv_w, conv_b, bn_gamma, bn_beta, stride, padding,
                *, tile_m=None, stream_dtype=jnp.bfloat16, conv_dtype=jnp.bfloat16):
    """x_nchw: (N, Cin, H, W); conv_w: (Cout, Cin, KH, KW) as in PyTorch."""
    del conv_b  # Cancelled exactly by BatchNorm's mean subtraction -> drop the add.
    n, cin, h, w = x_nchw.shape
    cout, _, kh, kw = conv_w.shape
    s = stride
    hp, wp = h + 2 * padding, w + 2 * padding
    oh = (hp - kh) // s + 1
    ow = (wp - kw) // s + 1
    lp = hp * wp                                        # per-image flat padded length
    m_total = n * lp                                    # stride-1 wide-conv length

    cin_pad = _round_up(cin, _sublane(stream_dtype))
    cout_pad = _round_up(cout, max(_sublane(conv_dtype), 8))

    halo = (kh - 1) * wp + (kw - 1)                     # max tap offset
    halo_w = _round_up(max(halo, 1), LANE)

    if tile_m is None:
        tile_m = _pick_tile_m(m_total, halo_w, cin_pad, cout_pad,
                              jnp.dtype(stream_dtype).itemsize,
                              jnp.dtype(conv_dtype).itemsize)
    else:
        tile_m = _round_up(max(tile_m, halo_w), halo_w)
    m_pad = _round_up(m_total, tile_m)
    num_tiles = m_pad // tile_m
    ratio = tile_m // halo_w                            # halo blocks per main tile

    # ---- flattened, channel-major, zero-padded input (cin_pad, m_pad + halo_w) ----
    x_p = jnp.pad(x_nchw, ((0, 0), (0, 0), (padding, padding), (padding, padding)))
    x_flat = jnp.transpose(x_p, (1, 0, 2, 3)).reshape(cin, m_total)
    x_flat = jnp.pad(x_flat, ((0, cin_pad - cin), (0, m_pad + halo_w - m_total)))
    x_flat = x_flat.astype(stream_dtype)

    # ---- per-tap weight matrices (kh*kw, cout_pad, cin_pad) -----------------------
    w_taps = jnp.transpose(conv_w, (2, 3, 0, 1)).reshape(kh * kw, cout, cin)
    w_taps = jnp.pad(w_taps, ((0, 0), (0, cout_pad - cout), (0, cin_pad - cin)))
    w_taps = w_taps.astype(stream_dtype)
    tap_offsets = tuple(i * wp + j for i in range(kh) for j in range(kw))
    n_taps = kh * kw

    # ---- validity mask over the wide output grid (1, m_pad) -----------------------
    mm = jnp.arange(m_pad, dtype=jnp.int32)
    r = mm % lp
    row, col = r // wp, r % wp
    valid = ((mm < m_total)
             & (row % s == 0) & (row < s * oh)
             & (col % s == 0) & (col < s * ow))
    mask = valid.astype(stream_dtype).reshape(1, m_pad)

    mosaic = pltpu.CompilerParams(
        dimension_semantics=("parallel",),              # M tiles split across TCs (v7x)
        vmem_limit_bytes=32 * 1024 * 1024)

    kernel1 = functools.partial(_conv_stats_kernel,
                                tap_offsets=tap_offsets, tile_m=tile_m)

    # ---- Pass 1: shifted-tap conv + per-tile partial stats -------------------------
    conv_t, stats = pl.pallas_call(
        kernel1,
        grid=(num_tiles,),
        in_specs=[
            pl.BlockSpec((cin_pad, tile_m), lambda i: (0, i)),
            pl.BlockSpec((cin_pad, halo_w), lambda i: (0, (i + 1) * ratio)),
            pl.BlockSpec((n_taps, cout_pad, cin_pad), lambda i: (0, 0, 0)),
            pl.BlockSpec((1, tile_m), lambda i: (0, i)),
        ],
        out_specs=[
            pl.BlockSpec((cout_pad, tile_m), lambda i: (0, i)),
            pl.BlockSpec((1, cout_pad, 2), lambda i: (i, 0, 0)),
        ],
        out_shape=[
            jax.ShapeDtypeStruct((cout_pad, m_pad), conv_dtype),
            jax.ShapeDtypeStruct((num_tiles, cout_pad, 2), jnp.float32),
        ],
        scratch_shapes=[pltpu.VMEM((cin_pad, tile_m + halo_w), stream_dtype)],
        compiler_params=mosaic,
        cost_estimate=pl.CostEstimate(
            flops=2 * n_taps * cin_pad * cout_pad * m_pad,
            transcendentals=0,
            bytes_accessed=(x_flat.size * x_flat.dtype.itemsize
                            + m_pad * jnp.dtype(stream_dtype).itemsize
                            + cout_pad * m_pad * jnp.dtype(conv_dtype).itemsize)),
    )(x_flat, x_flat, w_taps, mask)

    # ---- Per-channel BN fold (tiny, plain JAX, all f32) ----------------------------
    # NOTE: E[x^2] - E[x]^2 in f32 partial sums; fine at these magnitudes and clamped,
    # but consider mean-shifted partials if |mean| >> std at very large N*OH*OW.
    s_sum = jnp.sum(stats, axis=0)                      # (cout_pad, 2)
    m_count = float(n * oh * ow)
    mean = s_sum[:, 0] / m_count
    var = jnp.maximum(s_sum[:, 1] / m_count - mean * mean, 0.0)
    gamma_p = jnp.pad(bn_gamma.astype(jnp.float32), (0, cout_pad - cout))
    beta_p = jnp.pad(bn_beta.astype(jnp.float32), (0, cout_pad - cout))
    scale = gamma_p * lax.rsqrt(var + EPS)
    shift = beta_p - mean * scale
    scale2 = scale.reshape(cout_pad, 1)
    shift2 = shift.reshape(cout_pad, 1)

    # ---- Pass 2: folded BN affine + LeakyReLU --------------------------------------
    out_wide = pl.pallas_call(
        _bn_lrelu_kernel,
        grid=(num_tiles,),
        in_specs=[
            pl.BlockSpec((cout_pad, tile_m), lambda i: (0, i)),
            pl.BlockSpec((cout_pad, 1), lambda i: (0, 0)),
            pl.BlockSpec((cout_pad, 1), lambda i: (0, 0)),
        ],
        out_specs=pl.BlockSpec((cout_pad, tile_m), lambda i: (0, i)),
        out_shape=jax.ShapeDtypeStruct((cout_pad, m_pad), jnp.float32),
        compiler_params=mosaic,
        cost_estimate=pl.CostEstimate(
            flops=3 * cout_pad * m_pad,
            transcendentals=0,
            bytes_accessed=cout_pad * m_pad * (jnp.dtype(conv_dtype).itemsize + 4)),
    )(conv_t, scale2, shift2)

    # ---- Extract the valid (N, Cout, OH, OW) result --------------------------------
    out = out_wide[:cout, :m_total].reshape(cout, n, hp, wp)
    out = out[:, :, 0:(oh - 1) * s + 1:s, 0:(ow - 1) * s + 1:s]
    return jnp.transpose(out, (1, 0, 2, 3))


# --------------------------------------------------------------------------- test


def _reference(x_nchw, conv_w, conv_b, bn_gamma, bn_beta, stride, padding):
    y = lax.conv_general_dilated(
        x_nchw, conv_w, window_strides=(stride, stride),
        padding=[(padding, padding), (padding, padding)],
        dimension_numbers=("NCHW", "OIHW", "NCHW"))
    y = y + conv_b.reshape(1, -1, 1, 1)
    mean = jnp.mean(y, axis=(0, 2, 3), keepdims=True)
    var = jnp.mean((y - mean) ** 2, axis=(0, 2, 3), keepdims=True)
    y = (y - mean) * lax.rsqrt(var + EPS)
    y = y * bn_gamma.reshape(1, -1, 1, 1) + bn_beta.reshape(1, -1, 1, 1)
    return jnp.where(y >= 0, y, NEG_SLOPE * y)


if __name__ == "__main__":
    # CBR(in_channels=4, out_channels=8, kernel_size=3, stride=1, padding=1)
    N, CIN, H, W = 2, 4, 16, 16
    COUT, KH, KW = 8, 3, 3
    STRIDE, PAD = 1, 1

    key = jax.random.PRNGKey(0)
    kx, kw_, kb = jax.random.split(key, 3)
    x = jax.random.normal(kx, (N, CIN, H, W), dtype=jnp.float32)
    conv_w = 0.1 * jax.random.normal(kw_, (COUT, CIN, KH, KW), dtype=jnp.float32)
    conv_b = 0.1 * jax.random.normal(kb, (COUT,), dtype=jnp.float32)
    bn_gamma = jnp.ones((COUT,), dtype=jnp.float32)     # BatchNorm2d default init
    bn_beta = jnp.zeros((COUT,), dtype=jnp.float32)

    ref = _reference(x, conv_w, conv_b, bn_gamma, bn_beta, STRIDE, PAD)

    # Default (production) config: bf16 streams, auto (large) tile -> single tile here.
    out_bf16 = cbr_forward(x, conv_w, conv_b, bn_gamma, bn_beta, STRIDE, PAD)
    out_bf16 = jax.block_until_ready(out_bf16)
    assert out_bf16.shape == (N, COUT, H, W)
    # bf16-stream tolerance (stats & BN fold stay f32).
    assert jnp.allclose(out_bf16, ref, atol=2e-2, rtol=2e-2)

    # f32 config with a small forced tile (3 M-tiles): exercises the multi-tile halo +
    # partial-stats accumulation path and checks near-exact numerics.
    out_f32 = cbr_forward(x, conv_w, conv_b, bn_gamma, bn_beta, STRIDE, PAD,
                          tile_m=256, stream_dtype=jnp.float32,
                          conv_dtype=jnp.float32)
    out_f32 = jax.block_until_ready(out_f32)
    assert jnp.allclose(out_f32, ref, atol=1e-3, rtol=1e-3)

    print("KERNEL_OK")
</pallas_src>

<mosaic_0001>
module attributes {stable_mosaic.version = 11 : i64} {
  func.func @_conv_stats_kernel(%arg0: i32, %arg1: memref<16x768xbf16, #tpu.memory_space<vmem>>, %arg2: memref<16x128xbf16, #tpu.memory_space<vmem>>, %arg3: memref<9x16x16xbf16, #tpu.memory_space<vmem>>, %arg4: memref<1x768xbf16, #tpu.memory_space<vmem>>, %arg5: memref<16x768xbf16, #tpu.memory_space<vmem>>, %arg6: memref<1x16x2xf32, #tpu.memory_space<vmem>>, %arg7: memref<16x896xbf16, #tpu.memory_space<vmem>>) attributes {dimension_semantics = [#tpu.dimension_semantics<parallel>], iteration_bounds = array<i64: 1>, scalar_prefetch = 0 : i64, scratch_operands = 1 : i64, tpu.core_type = #tpu.core_type<tc>, window_params = [{transform_indices = @transform_0, window_bounds = array<i64: 16, 768>}, {transform_indices = @transform_1, window_bounds = array<i64: 16, 128>}, {pipeline_mode = #tpu.pipeline_mode<synchronous>, transform_indices = @transform_2, window_bounds = array<i64: 9, 16, 16>}, {transform_indices = @transform_3, window_bounds = array<i64: 1, 768>}, {transform_indices = @transform_4, window_bounds = array<i64: 16, 768>}, {transform_indices = @transform_5, window_bounds = array<i64: 1, 16, 2>}]} {
    %c0 = arith.constant 0 : index
    %c0_0 = arith.constant 0 : index
    %0 = vector.load %arg1[%c0, %c0_0] : memref<16x768xbf16, #tpu.memory_space<vmem>>, vector<16x768xbf16>
    %c0_1 = arith.constant 0 : index
    %c0_2 = arith.constant 0 : index
    %1 = vector.load %arg7[%c0_1, %c0_2] : memref<16x896xbf16, #tpu.memory_space<vmem>>, vector<16x768xbf16>
    tpu.vector_store %arg7[%c0_1, %c0_2], %0 {strides = array<i32>} : memref<16x896xbf16, #tpu.memory_space<vmem>>, vector<16x768xbf16>,
    %c0_3 = arith.constant 0 : index
    %c0_4 = arith.constant 0 : index
    %2 = vector.load %arg2[%c0_3, %c0_4] : memref<16x128xbf16, #tpu.memory_space<vmem>>, vector<16x128xbf16>
    %c0_5 = arith.constant 0 : index
    %c768 = arith.constant 768 : index
    %3 = vector.load %arg7[%c0_5, %c768] : memref<16x896xbf16, #tpu.memory_space<vmem>>, vector<16x128xbf16>
    tpu.vector_store %arg7[%c0_5, %c768], %2 {strides = array<i32>} : memref<16x896xbf16, #tpu.memory_space<vmem>>, vector<16x128xbf16>,
    %c0_6 = arith.constant 0 : index
    %c0_7 = arith.constant 0 : index
    %4 = vector.load %arg7[%c0_6, %c0_7] : memref<16x896xbf16, #tpu.memory_space<vmem>>, vector<16x896xbf16>
    %5 = vector.extract_strided_slice %4 {offsets = [0, 0], sizes = [16, 768], strides = [1, 1]} : vector<16x896xbf16> to vector<16x768xbf16>
    %c0_8 = arith.constant 0 : index
    %c0_9 = arith.constant 0 : index
    %c0_10 = arith.constant 0 : index
    %6 = vector.load %arg3[%c0_8, %c0_9, %c0_10] : memref<9x16x16xbf16, #tpu.memory_space<vmem>>, vector<1x16x16xbf16>
    %7 = vector.shape_cast %6 : vector<1x16x16xbf16> to vector<16x16xbf16>
    %cst = arith.constant dense<0.000000e+00> : vector<16x768xf32>
    %8 = tpu.matmul %7, %5, %cst {dimension_numbers = #tpu.dot_dimension_numbers<[1], [0], [0], [1], [0, 0, 1, 1], [], []>} : vector<16x16xbf16>, vector<16x768xbf16>, vector<16x768xf32> -> vector<16x768xf32>
    %9 = vector.extract_strided_slice %4 {offsets = [0, 1], sizes = [16, 768], strides = [1, 1]} : vector<16x896xbf16> to vector<16x768xbf16>
    %c1 = arith.constant 1 : index
    %c0_11 = arith.constant 0 : index
    %c0_12 = arith.constant 0 : index
    %10 = vector.load %arg3[%c1, %c0_11, %c0_12] : memref<9x16x16xbf16, #tpu.memory_space<vmem>>, vector<1x16x16xbf16>
    %11 = vector.shape_cast %10 : vector<1x16x16xbf16> to vector<16x16xbf16>
    %cst_13 = arith.constant dense<0.000000e+00> : vector<16x768xf32>
    %12 = tpu.matmul %11, %9, %cst_13 {dimension_numbers = #tpu.dot_dimension_numbers<[1], [0], [0], [1], [0, 0, 1, 1], [], []>} : vector<16x16xbf16>, vector<16x768xbf16>, vector<16x768xf32> -> vector<16x768xf32>
    %13 = arith.addf %8, %12 : vector<16x768xf32>
    %14 = vector.extract_strided_slice %4 {offsets = [0, 2], sizes = [16, 768], strides = [1, 1]} : vector<16x896xbf16> to vector<16x768xbf16>
    %c2 = arith.constant 2 : index
    %c0_14 = arith.constant 0 : index
    %c0_15 = arith.constant 0 : index
    %15 = vector.load %arg3[%c2, %c0_14, %c0_15] : memref<9x16x16xbf16, #tpu.memory_space<vmem>>, vector<1x16x16xbf16>
    %16 = vector.shape_cast %15 : vector<1x16x16xbf16> to vector<16x16xbf16>
    %cst_16 = arith.constant dense<0.000000e+00> : vector<16x768xf32>
    %17 = tpu.matmul %16, %14, %cst_16 {dimension_numbers = #tpu.dot_dimension_numbers<[1], [0], [0], [1], [0, 0, 1, 1], [], []>} : vector<16x16xbf16>, vector<16x768xbf16>, vector<16x768xf32> -> vector<16x768xf32>
    %18 = arith.addf %13, %17 : vector<16x768xf32>
    %19 = vector.extract_strided_slice %4 {offsets = [0, 18], sizes = [16, 768], strides = [1, 1]} : vector<16x896xbf16> to vector<16x768xbf16>
    %c3 = arith.constant 3 : index
    %c0_17 = arith.constant 0 : index
    %c0_18 = arith.constant 0 : index
    %20 = vector.load %arg3[%c3, %c0_17, %c0_18] : memref<9x16x16xbf16, #tpu.memory_space<vmem>>, vector<1x16x16xbf16>
    %21 = vector.shape_cast %20 : vector<1x16x16xbf16> to vector<16x16xbf16>
    %cst_19 = arith.constant dense<0.000000e+00> : vector<16x768xf32>
    %22 = tpu.matmul %21, %19, %cst_19 {dimension_numbers = #tpu.dot_dimension_numbers<[1], [0], [0], [1], [0, 0, 1, 1], [], []>} : vector<16x16xbf16>, vector<16x768xbf16>, vector<16x768xf32> -> vector<16x768xf32>
    %23 = arith.addf %18, %22 : vector<16x768xf32>
    %24 = vector.extract_strided_slice %4 {offsets = [0, 19], sizes = [16, 768], strides = [1, 1]} : vector<16x896xbf16> to vector<16x768xbf16>
    %c4 = arith.constant 4 : index
    %c0_20 = arith.constant 0 : index
    %c0_21 = arith.constant 0 : index
    %25 = vector.load %arg3[%c4, %c0_20, %c0_21] : memref<9x16x16xbf16, #tpu.memory_space<vmem>>, vector<1x16x16xbf16>
    %26 = vector.shape_cast %25 : vector<1x16x16xbf16> to vector<16x16xbf16>
    %cst_22 = arith.constant dense<0.000000e+00> : vector<16x768xf32>
    %27 = tpu.matmul %26, %24, %cst_22 {dimension_numbers = #tpu.dot_dimension_numbers<[1], [0], [0], [1], [0, 0, 1, 1], [], []>} : vector<16x16xbf16>, vector<16x768xbf16>, vector<16x768xf32> -> vector<16x768xf32>
    %28 = arith.addf %23, %27 : vector<16x768xf32>
    %29 = vector.extract_strided_slice %4 {offsets = [0, 20], sizes = [16, 768], strides = [1, 1]} : vector<16x896xbf16> to vector<16x768xbf16>
    %c5 = arith.constant 5 : index
    %c0_23 = arith.constant 0 : index
    %c0_24 = arith.constant 0 : index
    %30 = vector.load %arg3[%c5, %c0_23, %c0_24] : memref<9x16x16xbf16, #tpu.memory_space<vmem>>, vector<1x16x16xbf16>
    %31 = vector.shape_cast %30 : vector<1x16x16xbf16> to vector<16x16xbf16>
    %cst_25 = arith.constant dense<0.000000e+00> : vector<16x768xf32>
    %32 = tpu.matmul %31, %29, %cst_25 {dimension_numbers = #tpu.dot_dimension_numbers<[1], [0], [0], [1], [0, 0, 1, 1], [], []>} : vector<16x16xbf16>, vector<16x768xbf16>, vector<16x768xf32> -> vector<16x768xf32>
    %33 = arith.addf %28, %32 : vector<16x768xf32>
    %34 = vector.extract_strided_slice %4 {offsets = [0, 36], sizes = [16, 768], strides = [1, 1]} : vector<16x896xbf16> to vector<16x768xbf16>
    %c6 = arith.constant 6 : index
    %c0_26 = arith.constant 0 : index
    %c0_27 = arith.constant 0 : index
    %35 = vector.load %arg3[%c6, %c0_26, %c0_27] : memref<9x16x16xbf16, #tpu.memory_space<vmem>>, vector<1x16x16xbf16>
    %36 = vector.shape_cast %35 : vector<1x16x16xbf16> to vector<16x16xbf16>
    %cst_28 = arith.constant dense<0.000000e+00> : vector<16x768xf32>
    %37 = tpu.matmul %36, %34, %cst_28 {dimension_numbers = #tpu.dot_dimension_numbers<[1], [0], [0], [1], [0, 0, 1, 1], [], []>} : vector<16x16xbf16>, vector<16x768xbf16>, vector<16x768xf32> -> vector<16x768xf32>
    %38 = arith.addf %33, %37 : vector<16x768xf32>
    %39 = vector.extract_strided_slice %4 {offsets = [0, 37], sizes = [16, 768], strides = [1, 1]} : vector<16x896xbf16> to vector<16x768xbf16>
    %c7 = arith.constant 7 : index
    %c0_29 = arith.constant 0 : index
    %c0_30 = arith.constant 0 : index
    %40 = vector.load %arg3[%c7, %c0_29, %c0_30] : memref<9x16x16xbf16, #tpu.memory_space<vmem>>, vector<1x16x16xbf16>
    %41 = vector.shape_cast %40 : vector<1x16x16xbf16> to vector<16x16xbf16>
    %cst_31 = arith.constant dense<0.000000e+00> : vector<16x768xf32>
    %42 = tpu.matmul %41, %39, %cst_31 {dimension_numbers = #tpu.dot_dimension_numbers<[1], [0], [0], [1], [0, 0, 1, 1], [], []>} : vector<16x16xbf16>, vector<16x768xbf16>, vector<16x768xf32> -> vector<16x768xf32>
    %43 = arith.addf %38, %42 : vector<16x768xf32>
    %44 = vector.extract_strided_slice %4 {offsets = [0, 38], sizes = [16, 768], strides = [1, 1]} : vector<16x896xbf16> to vector<16x768xbf16>
    %c8 = arith.constant 8 : index
    %c0_32 = arith.constant 0 : index
    %c0_33 = arith.constant 0 : index
    %45 = vector.load %arg3[%c8, %c0_32, %c0_33] : memref<9x16x16xbf16, #tpu.memory_space<vmem>>, vector<1x16x16xbf16>
    %46 = vector.shape_cast %45 : vector<1x16x16xbf16> to vector<16x16xbf16>
    %cst_34 = arith.constant dense<0.000000e+00> : vector<16x768xf32>
    %47 = tpu.matmul %46, %44, %cst_34 {dimension_numbers = #tpu.dot_dimension_numbers<[1], [0], [0], [1], [0, 0, 1, 1], [], []>} : vector<16x16xbf16>, vector<16x768xbf16>, vector<16x768xf32> -> vector<16x768xf32>
    %48 = arith.addf %43, %47 : vector<16x768xf32>
    %49 = arith.truncf %48 : vector<16x768xf32> to vector<16x768xbf16>
    %c0_35 = arith.constant 0 : index
    %c0_36 = arith.constant 0 : index
    %50 = vector.load %arg5[%c0_35, %c0_36] : memref<16x768xbf16, #tpu.memory_space<vmem>>, vector<16x768xbf16>
    tpu.vector_store %arg5[%c0_35, %c0_36], %49 {strides = array<i32>} : memref<16x768xbf16, #tpu.memory_space<vmem>>, vector<16x768xbf16>,
    %c0_37 = arith.constant 0 : index
    %c0_38 = arith.constant 0 : index
    %51 = vector.load %arg4[%c0_37, %c0_38] : memref<1x768xbf16, #tpu.memory_space<vmem>>, vector<1x768xbf16>
    %52 = arith.extf %51 : vector<1x768xbf16> to vector<1x768xf32>
    %53 = vector.broadcast %52 : vector<1x768xf32> to vector<16x768xf32>
    %54 = arith.mulf %48, %53 : vector<16x768xf32>
    %cst_39 = arith.constant dense<0.000000e+00> : vector<16xf32>
    %55 = vector.multi_reduction <add>, %54, %cst_39 [1] : vector<16x768xf32> to vector<16xf32>
    %56 = vector.shape_cast %55 : vector<16xf32> to vector<16x1xf32>
    %57 = arith.mulf %54, %48 : vector<16x768xf32>
    %cst_40 = arith.constant dense<0.000000e+00> : vector<16xf32>
    %58 = vector.multi_reduction <add>, %57, %cst_40 [1] : vector<16x768xf32> to vector<16xf32>
    %59 = vector.shape_cast %58 : vector<16xf32> to vector<16x1xf32>
    %60 = tpu.concatenate %56, %59 in 1 : vector<16x1xf32>, vector<16x1xf32> -> vector<16x2xf32>
    %c0_41 = arith.constant 0 : index
    %c0_42 = arith.constant 0 : index
    %c0_43 = arith.constant 0 : index
    %61 = vector.load %arg6[%c0_41, %c0_42, %c0_43] : memref<1x16x2xf32, #tpu.memory_space<vmem>>, vector<1x16x2xf32>
    %62 = vector.shape_cast %61 : vector<1x16x2xf32> to vector<16x2xf32>
    %63 = vector.shape_cast %60 : vector<16x2xf32> to vector<1x16x2xf32>
    tpu.vector_store %arg6[%c0_41, %c0_42, %c0_43], %63 {strides = array<i32>} : memref<1x16x2xf32, #tpu.memory_space<vmem>>, vector<1x16x2xf32>,
    return
  }
  func.func @transform_0(%arg0: i32) -> (i32, i32) {
    %c0_i32 = arith.constant 0 : i32
    %c0_i32_0 = arith.constant 0 : i32
    return %c0_i32, %arg0 : i32, i32
  }
  func.func @transform_1(%arg0: i32) -> (i32, i32) {
    %c1_i32 = arith.constant 1 : i32
    %0 = arith.addi %arg0, %c1_i32 : i32
    %c6_i32 = arith.constant 6 : i32
    %1 = arith.muli %0, %c6_i32 : i32
    %c0_i32 = arith.constant 0 : i32
    %c0_i32_0 = arith.constant 0 : i32
    return %c0_i32, %1 : i32, i32
  }
  func.func @transform_2(%arg0: i32) -> (i32, i32, i32) {
    %c0_i32 = arith.constant 0 : i32
    %c0_i32_0 = arith.constant 0 : i32
    %c0_i32_1 = arith.constant 0 : i32
    %c0_i32_2 = arith.constant 0 : i32
    return %c0_i32, %c0_i32_0, %c0_i32_1 : i32, i32, i32
  }
  func.func @transform_3(%arg0: i32) -> (i32, i32) {
    %c0_i32 = arith.constant 0 : i32
    %c0_i32_0 = arith.constant 0 : i32
    return %c0_i32, %arg0 : i32, i32
  }
  func.func @transform_4(%arg0: i32) -> (i32, i32) {
    %c0_i32 = arith.constant 0 : i32
    %c0_i32_0 = arith.constant 0 : i32
    return %c0_i32, %arg0 : i32, i32
  }
  func.func @transform_5(%arg0: i32) -> (i32, i32, i32) {
    %c0_i32 = arith.constant 0 : i32
    %c0_i32_0 = arith.constant 0 : i32
    %c0_i32_1 = arith.constant 0 : i32
    return %arg0, %c0_i32, %c0_i32_0 : i32, i32, i32
  }
}

</mosaic_0001>

<bundles_post_ra>
// kernel: tpu_custom_call.1
= control target key start
LH: loop header
LB: loop body
LE: loop exit
PB: predicated region body
PF: predicated region fallthrough
CT: control target
= control target key end

     0   :  { %11 = vsyncpa [#allocation4], 0  ;;  %s2464_s0 = inlined_call_operand.hbm [shape: bf16[16,896], index: 0, kind: input, shape index: {}]   ;;  %s2465_s1 = inlined_call_operand.hbm [shape: bf16[16,896], index: 1, kind: input, shape index: {}]   ;;  %s2466_s2 = inlined_call_operand.hbm [shape: bf16[9,16,16], index: 2, kind: input, shape index: {}]   ;;  %s2467_s3 = inlined_call_operand.vmem [shape: bf16[1,768], index: 3, kind: input, shape index: {}]   ;;  %s2468_s4 = inlined_call_operand.hbm [shape: bf16[16,768], index: 4, kind: output, shape index: {0}]   ;;  %s2469_s5 = inlined_call_operand.vmem [shape: f32[1,16,2], index: 5, kind: output, shape index: {1}]  }
   0x1   :  { %12 = vsyncpa [#allocation7], 0  ;;  %s1874_s20 = scalar_lea.hbm %s2465_s1, 384 }
   0x2   :  { %13 = vsyncpa [#allocation5], 0  ;;  %s2160_s21 = smov [#allocation6]   ;;  %s2087_s25 = scalar_lea.hbm %s2465_s1, 512 }
   0x3   :  { %s35_s22 = sshll.u32 %s2160_s21, 4  ;;  %p2064_p0 = scmp.ne.s32.totalorder %s1874_s20, %s2087_s25  ;;  %s36_s22 = int_to_ptr.vmem [resolvable:$true] %s35_s22 }
   0x4   :  { %s2065_s28 = scalar_lea.hbm %s2465_s1, 896  ;;  %p2066_p1 = scmp.lt.u32.totalorder %s1874_s20, %s2465_s1 }
   0x5   :  { %p2067_p2 = scmp.lt.u32.totalorder %s2065_s28, %s2087_s25  ;;  %p2069_p4 = scmp.lt.u32.totalorder %s2087_s25, %s1874_s20 }
   0x7   :  { %p2068_p3 = por %p2067_p2, %p2066_p1 }
   0x9   :  { %p2070_p5 = por %p2069_p4, %p2068_p3 }
   0xb   :  { %p2071_p6 = pnand %p2070_p5, %p2064_p0 }
   0xd   :  { %2074 = shalt.err (!%p2071_p6)
}
   0xe   :  { %s2075_s6 = scalar_lea.vmem %s36_s22, 128  ;;  %p2080_p8 = scmp.lt.s32.totalorder %s36_s22, %s36_s22 }
   0xf   :  { %p2076_p7 = scmp.ne.s32.totalorder %s36_s22, %s2075_s6  ;;  %p2081_p9 = scmp.lt.s32.totalorder %s2075_s6, %s2075_s6 }
  0x11   :  { %p2082_p10 = por %p2081_p9, %p2080_p8 }
  0x13   :  { %p2083_p11 = pnand %p2082_p10, %p2076_p7 }
  0x15   :  { %2086 = shalt.err (!%p2083_p11)
}
  0x16   :  { %s2161_s7 = smov 448   ;;  %s2162_s8 = smov 64  }
  0x17   :  { %s2163_s9 = smov 4   ;;  %s2164_s1 = smov [#allocation3]  }
  0x18   :  { %41 = dma.hbm_to_vmem [thread:$0]  %s1874_s20, 128, %s36_s22, [#allocation7], %s2161_s7, %s2162_s8, %s2163_s9  }
  0x19   :  { %s19_s10 = sshll.u32 %s2164_s1, 4  ;;  %s2088_s13 = scalar_lea.hbm %s2464_s0, 768  ;;  %s20_s10 = int_to_ptr.vmem [resolvable:$true] %s19_s10 }
  0x1a   :  { %p2089_p12 = scmp.ne.s32.totalorder %s2464_s0, %s2088_s13  ;;  %s2090_s18 = scalar_lea.hbm %s2464_s0, 896 }
  0x1b   :  { %p2091_p13 = scmp.lt.u32.totalorder %s2090_s18, %s2088_s13  ;;  %p2092_p0 = scmp.lt.u32.totalorder %s2088_s13, %s2464_s0 }
  0x1d   :  { %p2093_p1 = por %p2092_p0, %p2091_p13 }
  0x1f   :  { %p2094_p2 = pnand %p2093_p1, %p2089_p12 }
  0x21   :  { %2097 = shalt.err (!%p2094_p2)
}
  0x22   :  { %s2098_s20 = scalar_lea.vmem %s20_s10, 768  ;;  %p2103_p4 = scmp.lt.s32.totalorder %s20_s10, %s20_s10 }
  0x23   :  { %p2099_p3 = scmp.ne.s32.totalorder %s20_s10, %s2098_s20  ;;  %p2104_p5 = scmp.lt.s32.totalorder %s2098_s20, %s2098_s20 }
  0x25   :  { %p2105_p6 = por %p2104_p5, %p2103_p4 }
  0x27   :  { %p2106_p7 = pnand %p2105_p6, %p2099_p3 }
  0x29   :  { %2109 = shalt.err (!%p2106_p7)
}
  0x2a   :  { %s2165_s22 = smov 384   ;;  %s2166_s23 = smov 24  }
  0x2b   :  { %25 = dma.hbm_to_vmem [thread:$0]  %s2464_s0, 768, %s20_s10, [#allocation4], %s2161_s7, %s2165_s22, %s2166_s23  }
  0x2c   :  { %s2167_s26 = smov [#allocation8]   ;;  %s2110_s30 = scalar_lea.hbm %s2466_s2, 1152 }
  0x2d   :  { %s47_s27 = sshll.u32 %s2167_s26, 4  ;;  %p2111_p8 = scmp.ne.s32.totalorder %s2466_s2, %s2110_s30  ;;  %s48_s27 = int_to_ptr.vmem [resolvable:$true] %s47_s27 }
  0x2e   :  { %p2114_p9 = scmp.lt.u32.totalorder %s2110_s30, %s2466_s2 }
  0x30   :  { %p2116_p10 = pnand %p2114_p9, %p2111_p8 }
  0x32   :  { %2119 = shalt.err (!%p2116_p10)
}
  0x33   :  { %s2120_s13 = scalar_lea.vmem %s48_s27, 1152  ;;  %p2125_p12 = scmp.lt.s32.totalorder %s48_s27, %s48_s27 }
  0x34   :  { %p2121_p11 = scmp.ne.s32.totalorder %s48_s27, %s2120_s13  ;;  %p2126_p13 = scmp.lt.s32.totalorder %s2120_s13, %s2120_s13 }
  0x36   :  { %p2127_p0 = por %p2126_p13, %p2125_p12 }
  0x38   :  { %p2128_p1 = pnand %p2127_p0, %p2121_p11 }
  0x3a   :  { %2131 = shalt.err (!%p2128_p1)
}
  0x3b   :  { %53 = dma.hbm_to_vmem [thread:$0]  %s2466_s2, 1152, %s48_s27, [#allocation7], %s2162_s8, %s2162_s8, %s2163_s9  }
  0x3c   :  { %2154 = dma.done.wait [#allocation4], 768  }
  0x3d   :  { %2155 = vsyncadd [#allocation4], 4294966528 }
  0x3e   :  { %2156 = dma.done.wait [#allocation7], 1280  }
  0x3f   :  { %2157 = vsyncadd [#allocation7], 4294966016  ;;  %v2168_v0 = vmov 0   ;;  %v2256_v1 = vld [vmem:[#allocation3 + $0x4] ss:$24 sps:$4 sm:$0xff]   ;;  %s2169_s10 = smov 127  }
  0x40   :  { %206 = vmatprep.mubr.bf16.mxu1 %v2168_v0  ;;  %510 = vmatprep.mubr.bf16.mxu0 %v2168_v0  ;;  %v2258_v2 = vld [vmem:[#allocation3] ss:$24 sps:$4 sm:$0xff]   ;;  %v2264_v4 = vld [vmem:[#allocation3 + $0xc] ss:$24 sps:$4 sm:$0xff]   ;;  %v2266_v5 = vld [vmem:[#allocation3 + $0x10] ss:$24 sps:$4 sm:$0xff]  }
  0x41   :  { %145 = vrot.lane.b32.xlu0 %v2256_v1, %s2169_s10  ;;  %v2261_v3 = vld [vmem:[#allocation3 + $0x8] ss:$24 sps:$4 sm:$0xff]   ;;  %143 = vrot.lane.b32.xlu1 %v2258_v2, %s2169_s10  ;;  %v2268_v6 = vld [vmem:[#allocation3 + $0x14] ss:$24 sps:$4 sm:$0xff]   ;;  %s2170_s2 = smov 126   ;;  %s2171_s8 = smov 110  }
  0x42   :  { %v2053_v7 = vld [vmem:[#allocation6] sm:$0xff]   ;;  %s2172_s9 = smov 109   ;;  %s2173_s14 = smov 108   ;;  %vm157_vm0 = vcmask 1039360   ;;  %v2054_v14 = vld [vmem:[#allocation8 + $0x8] sm:$0xff]   ;;  %vm170_vm1 = vcmask 130048  }
  0x43   :  { %s2174_s15 = smov 92   ;;  %s2175_s16 = smov 91   ;;  %vm462_vm2 = vcmask 1031168   ;;  %v2330_v27 = vld [vmem:[#allocation8 + $0x10] sm:$0xff]   ;;  %vm641_vm3 = vcmask 900096   ;;  %v2056_v38 = vld [vmem:[#allocation8] sm:$0xff]  }
  0x44   :  { %s2176_s17 = smov 90   ;;  %v2353_v42 = vld [vmem:[#allocation8 + $0x18] sm:$0xff]   ;;  %vm820_vm4 = vcmask 891904   ;;  %v2058_v57 = vld [vmem:[#allocation8 + $0x20] sm:$0xff]   ;;  %vm999_vm5 = vcmask 883712   ;;  %vm1178_vm6 = vcmask 752640  }
  0x45   :  { %147 = vrot.lane.b32.xlu0 %v2261_v3, %s2169_s10  ;;  %149 = vrot.lane.b32.xlu1 %v2264_v4, %s2169_s10  ;;  %vm1357_vm7 = vcmask 744448   ;;  %vm1536_vm8 = vcmask 736256  }
  0x49   :  { %151 = vrot.lane.b32.xlu0 %v2266_v5, %s2169_s10  ;;  %153 = vrot.lane.b32.xlu1 %v2268_v6, %s2169_s10 }
  0x4d   :  { %155 = vrot.lane.b32.xlu0 %v2053_v7, %s2169_s10  ;;  %450 = vrot.lane.b32.xlu1 %v2256_v1, %s2170_s2 }
  0x51   :  { %452 = vrot.lane.b32.xlu0 %v2261_v3, %s2170_s2  ;;  %448 = vrot.lane.b32.xlu1 %v2258_v2, %s2170_s2 }
  0x55   :  { %458 = vrot.lane.b32.xlu0 %v2268_v6, %s2170_s2  ;;  %460 = vrot.lane.b32.xlu1 %v2053_v7, %s2170_s2 }
  0x59   :  { %456 = vrot.lane.b32.xlu0 %v2266_v5, %s2170_s2  ;;  %629 = vrot.lane.b32.xlu1 %v2256_v1, %s2171_s8 }
  0x5d   :  { %631 = vrot.lane.b32.xlu0 %v2261_v3, %s2171_s8  ;;  %627 = vrot.lane.b32.xlu1 %v2258_v2, %s2171_s8 }
  0x61   :  { %637 = vrot.lane.b32.xlu0 %v2268_v6, %s2171_s8  ;;  %639 = vrot.lane.b32.xlu1 %v2053_v7, %s2171_s8 }
  0x65   :  { %635 = vrot.lane.b32.xlu0 %v2266_v5, %s2171_s8  ;;  %454 = vrot.lane.b32.xlu1 %v2264_v4, %s2170_s2 }
  0x69   :  { %808 = vrot.lane.b32.xlu0 %v2256_v1, %s2172_s9  ;;  %810 = vrot.lane.b32.xlu1 %v2261_v3, %s2172_s9 }
  0x6d   :  { %806 = vrot.lane.b32.xlu0 %v2258_v2, %s2172_s9  ;;  %816 = vrot.lane.b32.xlu1 %v2268_v6, %s2172_s9 }
  0x71   :  { %818 = vrot.lane.b32.xlu0 %v2053_v7, %s2172_s9  ;;  %814 = vrot.lane.b32.xlu1 %v2266_v5, %s2172_s9 }
  0x75   :  { %633 = vrot.lane.b32.xlu0 %v2264_v4, %s2171_s8  ;;  %987 = vrot.lane.b32.xlu1 %v2256_v1, %s2173_s14 }
  0x79   :  { %989 = vrot.lane.b32.xlu0 %v2261_v3, %s2173_s14  ;;  %985 = vrot.lane.b32.xlu1 %v2258_v2, %s2173_s14 }
  0x7d   :  { %812 = vrot.lane.b32.xlu0 %v2264_v4, %s2172_s9  ;;  %995 = vrot.lane.b32.xlu1 %v2268_v6, %s2173_s14 }
  0x81   :  { %997 = vrot.lane.b32.xlu0 %v2053_v7, %s2173_s14  ;;  %993 = vrot.lane.b32.xlu1 %v2266_v5, %s2173_s14 }
  0x85   :  { %1166 = vrot.lane.b32.xlu0 %v2256_v1, %s2174_s15  ;;  %1168 = vrot.lane.b32.xlu1 %v2261_v3, %s2174_s15 }
  0x89   :  { %1164 = vrot.lane.b32.xlu0 %v2258_v2, %s2174_s15  ;;  %991 = vrot.lane.b32.xlu1 %v2264_v4, %s2173_s14 }
  0x8d   :  { %1174 = vrot.lane.b32.xlu0 %v2268_v6, %s2174_s15  ;;  %1176 = vrot.lane.b32.xlu1 %v2053_v7, %s2174_s15 }
  0x91   :  { %1172 = vrot.lane.b32.xlu0 %v2266_v5, %s2174_s15  ;;  %1170 = vrot.lane.b32.xlu1 %v2264_v4, %s2174_s15 }
  0x95   :  { %1345 = vrot.lane.b32.xlu0 %v2256_v1, %s2175_s16  ;;  %1347 = vrot.lane.b32.xlu1 %v2261_v3, %s2175_s16 }
  0x99   :  { %1343 = vrot.lane.b32.xlu0 %v2258_v2, %s2175_s16  ;;  %1353 = vrot.lane.b32.xlu1 %v2268_v6, %s2175_s16 }
  0x9d   :  { %1355 = vrot.lane.b32.xlu0 %v2053_v7, %s2175_s16  ;;  %1351 = vrot.lane.b32.xlu1 %v2266_v5, %s2175_s16 }
  0xa1   :  { %1349 = vrot.lane.b32.xlu0 %v2264_v4, %s2175_s16  ;;  %1524 = vrot.lane.b32.xlu1 %v2256_v1, %s2176_s17 }
  0xa5   :  { %1526 = vrot.lane.b32.xlu0 %v2261_v3, %s2176_s17  ;;  %1522 = vrot.lane.b32.xlu1 %v2258_v2, %s2176_s17 }
  0xa9   :  { %1528 = vrot.lane.b32.xlu0 %v2264_v4, %s2176_s17  ;;  %1530 = vrot.lane.b32.xlu1 %v2266_v5, %s2176_s17 }
  0xad   :  { %1532 = vrot.lane.b32.xlu0 %v2268_v6, %s2176_s17  ;;  %1534 = vrot.lane.b32.xlu1 %v2053_v7, %s2176_s17 }
  0xb3   :  { %v146_v8 = vpop.permute.xlu0 %145  ;;  %v144_v9 = vpop.permute.xlu1 %143 }
  0xb4   :  { %v158_v13 = vsel %vm157_vm0, %v144_v9, %v146_v8 }
  0xb7   :  { %v148_v10 = vpop.permute.xlu0 %147  ;;  %v150_v11 = vpop.permute.xlu1 %149 }
  0xb8   :  { %v159_v12 = vsel %vm157_vm0, %v146_v8, %v148_v10  ;;  %v160_v18 = vsel %vm157_vm0, %v148_v10, %v150_v11  ;;  %v2059_v10 = vld [vmem:[#allocation8 + $0x28] sm:$0xff]  }
  0xb9   :  { %174 = vmatprep.subr.bf16.mxu1 %v159_v12 }
  0xba   :  { %175 = vmatpush1.bf16.msra.mxu1 %v158_v13 }
  0xbb   :  { %v152_v15 = vpop.permute.xlu0 %151  ;;  %v154_v16 = vpop.permute.xlu1 %153 }
  0xbc   :  { %v161_v17 = vsel %vm157_vm0, %v150_v11, %v152_v15  ;;  %v162_v25 = vsel %vm157_vm0, %v152_v15, %v154_v16 }
  0xbd   :  { %1883 = vmatmul.mubr.msk.bf16.vlgmr.msra.gmra.mrb[0].mxu1 %vm170_vm1, %v2054_v14  ;;  %217 = vmatprep.subr.bf16.mxu1 %v161_v17 }
  0xbe   :  { %218 = vmatpush1.bf16.msra.mxu1 %v160_v18  ;;  %249 = vmatprep.mubr.bf16.mxu1 %v2168_v0 }
  0xbf   :  { %v156_v19 = vpop.permute.xlu0 %155  ;;  %v451_v20 = vpop.permute.xlu1 %450 }
  0xc0   :  { %v163_v21 = vsel %vm157_vm0, %v154_v16, %v156_v19 }
  0xc1   :  { %260 = vmatprep.subr.bf16.mxu1 %v163_v21 }
  0xc3   :  { %v2323_v22 = vpop.permute.xlu0 %452  ;;  %v449_v23 = vpop.permute.xlu1 %448 }
  0xc4   :  { %v464_v24 = vsel %vm462_vm2, %v451_v20, %v2323_v22  ;;  %v463_v26 = vsel %vm462_vm2, %v449_v23, %v451_v20 }
  0xc5   :  { %1884 = vmatmul.mubr.msk.bf16.vlgmr.msra.gmra.mrb[4].mxu1 %vm170_vm1, %v2054_v14  ;;  %478 = vmatprep.subr.bf16.mxu0 %v464_v24 }
  0xc6   :  { %261 = vmatpush1.bf16.msra.mxu1 %v162_v25  ;;  %479 = vmatpush1.bf16.msra.mxu0 %v463_v26  ;;  %v2060_v26 = vld [vmem:[#allocation8 + $0x30] sm:$0xff]  }
  0xc7   :  { %v459_v28 = vpop.permute.xlu0 %458  ;;  %292 = vmatprep.mubr.bf16.mxu1 %v2168_v0  ;;  %311 = vmatprep.subr.bf16.mxu1 %v2256_v1  ;;  %v461_v29 = vpop.permute.xlu1 %460 }
  0xc8   :  { %v468_v30 = vsel %vm462_vm2, %v459_v28, %v461_v29 }
  0xc9   :  { %1891 = vmatmul.mubr.msk.bf16.vlgmr.msra.gmra.mrb[0].mxu0 %vm170_vm1, %v2330_v27  ;;  %564 = vmatprep.subr.bf16.mxu0 %v468_v30 }
  0xca   :  { %596 = vmatprep.mubr.bf16.mxu0 %v2168_v0 }
  0xcb   :  { %v457_v31 = vpop.permute.xlu0 %456  ;;  %v630_v33 = vpop.permute.xlu1 %629 }
  0xcc   :  { %v467_v32 = vsel %vm462_vm2, %v457_v31, %v459_v28 }
  0xcd   :  { %1885 = vmatmul.mubr.msk.bf16.vlgmr.msra.gmra.mrb[8].mxu1 %vm170_vm1, %v2054_v14  ;;  %565 = vmatpush1.bf16.msra.mxu0 %v467_v32 }
  0xce   :  { %312 = vmatpush1.bf16.msra.mxu1 %v2258_v2  ;;  %343 = vmatprep.mubr.bf16.mxu1 %v2168_v0 }
  0xcf   :  { %v2342_v34 = vpop.permute.xlu0 %631  ;;  %354 = vmatprep.subr.bf16.mxu1 %v2264_v4  ;;  %v628_v35 = vpop.permute.xlu1 %627 }
  0xd0   :  { %v643_v36 = vsel %vm641_vm3, %v630_v33, %v2342_v34  ;;  %v642_v37 = vsel %vm641_vm3, %v628_v35, %v630_v33 }
  0xd1   :  { %1893 = vmatmul.mubr.msk.bf16.vlgmr.msra.gmra.mrb[4].mxu0 %vm170_vm1, %v2330_v27  ;;  %657 = vmatprep.subr.bf16.mxu0 %v643_v36 }
  0xd2   :  { %658 = vmatpush1.bf16.msra.mxu0 %v642_v37  ;;  %689 = vmatprep.mubr.bf16.mxu0 %v2168_v0 }
  0xd3   :  { %v638_v39 = vpop.permute.xlu0 %637  ;;  %v640_v40 = vpop.permute.xlu1 %639 }
  0xd4   :  { %v647_v41 = vsel %vm641_vm3, %v638_v39, %v640_v40 }
  0xd5   :  { %1887 = vmatmul.mubr.msk.bf16.vlgmr.msra.gmra.mrb[0].mxu1 %vm170_vm1, %v2056_v38  ;;  %743 = vmatprep.subr.bf16.mxu0 %v647_v41 }
  0xd6   :  { %355 = vmatpush1.bf16.msra.mxu1 %v2261_v3  ;;  %386 = vmatprep.mubr.bf16.mxu1 %v2168_v0 }
  0xd7   :  { %v636_v43 = vpop.permute.xlu0 %635  ;;  %397 = vmatprep.subr.bf16.mxu1 %v2268_v6  ;;  %v455_v45 = vpop.permute.xlu1 %454 }
  0xd8   :  { %v646_v44 = vsel %vm641_vm3, %v636_v43, %v638_v39  ;;  %v466_v49 = vsel %vm462_vm2, %v455_v45, %v457_v31  ;;  %v465_v56 = vsel %vm462_vm2, %v2323_v22, %v455_v45 }
  0xd9   :  { %1895 = vmatmul.mubr.msk.bf16.vlgmr.msra.gmra.mrb[0].mxu0 %vm170_vm1, %v2353_v42 }
  0xda   :  { %744 = vmatpush1.bf16.msra.mxu0 %v646_v44  ;;  %775 = vmatprep.mubr.bf16.mxu0 %v2168_v0 }
  0xdb   :  { %v809_v46 = vpop.permute.xlu0 %808  ;;  %v811_v47 = vpop.permute.xlu1 %810 }
  0xdc   :  { %v822_v48 = vsel %vm820_vm4, %v809_v46, %v811_v47 }
  0xdd   :  { %1888 = vmatmul.mubr.msk.bf16.vlgmr.msra.gmra.mrb[4].mxu1 %vm170_vm1, %v2056_v38  ;;  %836 = vmatprep.subr.bf16.mxu0 %v822_v48 }
  0xde   :  { %398 = vmatpush1.bf16.msra.mxu1 %v2266_v5  ;;  %429 = vmatprep.mubr.bf16.mxu1 %v2168_v0 }
  0xdf   :  { %521 = vmatprep.subr.bf16.mxu1 %v466_v49  ;;  %v807_v50 = vpop.permute.xlu0 %806  ;;  %v817_v52 = vpop.permute.xlu1 %816 }
  0xe0   :  { %v821_v51 = vsel %vm820_vm4, %v807_v50, %v809_v46 }
  0xe1   :  { %1897 = vmatmul.mubr.msk.bf16.vlgmr.msra.gmra.mrb[4].mxu0 %vm170_vm1, %v2353_v42 }
  0xe2   :  { %837 = vmatpush1.bf16.msra.mxu0 %v821_v51  ;;  %868 = vmatprep.mubr.bf16.mxu0 %v2168_v0 }
  0xe3   :  { %v819_v53 = vpop.permute.xlu0 %818  ;;  %v815_v54 = vpop.permute.xlu1 %814 }
  0xe4   :  { %v826_v55 = vsel %vm820_vm4, %v817_v52, %v819_v53  ;;  %v825_v58 = vsel %vm820_vm4, %v815_v54, %v817_v52 }
  0xe5   :  { %1889 = vmatmul.mubr.msk.bf16.vlgmr.msra.gmra.mrb[8].mxu1 %vm170_vm1, %v2056_v38  ;;  %922 = vmatprep.subr.bf16.mxu0 %v826_v55  ;;  %v2062_v55 = vld [vmem:[#allocation8 + $0x40] sm:$0xff]  }
  0xe6   :  { %522 = vmatpush1.bf16.msra.mxu1 %v465_v56  ;;  %553 = vmatprep.mubr.bf16.mxu1 %v2168_v0 }
  0xe7   :  { %v634_v59 = vpop.permute.xlu0 %633  ;;  %v988_v60 = vpop.permute.xlu1 %987 }
  0xe8   :  { %v645_v61 = vsel %vm641_vm3, %v634_v59, %v636_v43  ;;  %v644_v2 = vsel %vm641_vm3, %v2342_v34, %v634_v59 }
  0xe9   :  { %700 = vmatprep.subr.bf16.mxu1 %v645_v61  ;;  %1899 = vmatmul.mubr.msk.bf16.vlgmr.msra.gmra.mrb[0].mxu0 %vm170_vm1, %v2058_v57 }
  0xea   :  { %923 = vmatpush1.bf16.msra.mxu0 %v825_v58  ;;  %954 = vmatprep.mubr.bf16.mxu0 %v2168_v0 }
  0xeb   :  { %v990_v62 = vpop.permute.xlu0 %989  ;;  %v986_v63 = vpop.permute.xlu1 %985 }
  0xec   :  { %v1001_v1 = vsel %vm999_vm5, %v988_v60, %v990_v62  ;;  %v1000_v3 = vsel %vm999_vm5, %v986_v63, %v988_v60 }
  0xed   :  { %1892 = vmatmul.mubr.msk.bf16.vlgmr.msra.gmra.mrb[4].mxu1 %vm170_vm1, %v2330_v27  ;;  %1015 = vmatprep.subr.bf16.mxu0 %v1001_v1 }
  0xee   :  { %701 = vmatpush1.bf16.msra.mxu1 %v644_v2  ;;  %732 = vmatprep.mubr.bf16.mxu1 %v2168_v0 }
  0xef   :  { %v813_v4 = vpop.permute.xlu0 %812  ;;  %v996_v5 = vpop.permute.xlu1 %995 }
  0xf0   :  { %v824_v6 = vsel %vm820_vm4, %v813_v4, %v815_v54  ;;  %v823_v14 = vsel %vm820_vm4, %v811_v47, %v813_v4 }
  0xf1   :  { %879 = vmatprep.subr.bf16.mxu1 %v824_v6  ;;  %1901 = vmatmul.mubr.msk.bf16.vlgmr.msra.gmra.mrb[4].mxu0 %vm170_vm1, %v2058_v57 }
  0xf2   :  { %1016 = vmatpush1.bf16.msra.mxu0 %v1000_v3  ;;  %1047 = vmatprep.mubr.bf16.mxu0 %v2168_v0  ;;  %v1740_v3 = vlaneseq }
  0xf3   :  { %v998_v7 = vpop.permute.xlu0 %997  ;;  %v994_v8 = vpop.permute.xlu1 %993 }
  0xf4   :  { %v1005_v9 = vsel %vm999_vm5, %v996_v5, %v998_v7  ;;  %v1004_v11 = vsel %vm999_vm5, %v994_v8, %v996_v5  ;;  %v1741_v4 = vshrl.u32 %v1740_v3, 7  ;;  %v1735_v5 = vld [vmem:[%s2467_s3] sm:$0x3f]  ;;  %s2177_s3 = smov [#allocation9]  }
  0xf5   :  { %1101 = vmatprep.subr.bf16.mxu0 %v1005_v9  ;;  %v1736_v6 = vunpack.c.l.bf16 %v1735_v5  ;;  %s1857_s21 = sshll.u32 %s2177_s3, 4  ;;  %s1858_s21 = int_to_ptr.vmem [resolvable:$true] %s1857_s21 }
  0xf6   :  { %v1746_v7 = vsub.s32 2, %v1741_v4  ;;  %s2132_s20 = scalar_lea.vmem %s1858_s21, 768  ;;  %p2137_p3 = scmp.lt.s32.totalorder %s1858_s21, %s1858_s21 }
  0xf7   :  { %v1167_v12 = vpop.permute.xlu0 %1166  ;;  %v1169_v13 = vpop.permute.xlu1 %1168  ;;  %p2133_p2 = scmp.ne.s32.totalorder %s1858_s21, %s2132_s20  ;;  %p2138_p4 = scmp.lt.s32.totalorder %s2132_s20, %s2132_s20 }
  0xf8   :  { %v1180_v15 = vsel %vm1178_vm6, %v1167_v12, %v1169_v13  ;;  %v1747_v9 = vrot.slane %v1736_v6, %v1746_v7 }
  0xf9   :  { %1896 = vmatmul.mubr.msk.bf16.vlgmr.msra.gmra.mrb[4].mxu1 %vm170_vm1, %v2353_v42  ;;  %1903 = vmatmul.mubr.msk.bf16.vlgmr.msra.gmra.mrb[0].mxu0 %vm170_vm1, %v2059_v10  ;;  %v2061_v42 = vld [vmem:[#allocation8 + $0x38] sm:$0xff]   ;;  %p2139_p5 = por %p2138_p4, %p2137_p3 }
  0xfa   :  { %880 = vmatpush1.bf16.msra.mxu1 %v823_v14  ;;  %1102 = vmatpush1.bf16.msra.mxu0 %v1004_v11 }
  0xfb   :  { %v1165_v16 = vpop.permute.xlu0 %1164  ;;  %1133 = vmatprep.mubr.bf16.mxu0 %v2168_v0  ;;  %1194 = vmatprep.subr.bf16.mxu0 %v1180_v15  ;;  %v992_v17 = vpop.permute.xlu1 %991  ;;  %p2140_p6 = pnand %p2139_p5, %p2133_p2 }
  0xfc   :  { %911 = vmatprep.mubr.bf16.mxu1 %v2168_v0  ;;  %v1003_v18 = vsel %vm999_vm5, %v992_v17, %v994_v8  ;;  %v1179_v19 = vsel %vm1178_vm6, %v1165_v16, %v1167_v12  ;;  %v1002_v25 = vsel %vm999_vm5, %v990_v62, %v992_v17  ;;  %v1750_v16 = vsub.s32 4, %v1741_v4 }
  0xfd   :  { %1058 = vmatprep.subr.bf16.mxu1 %v1003_v18  ;;  %v1754_v17 = vsub.s32 6, %v1741_v4 }
  0xff   :  { %v1175_v20 = vpop.permute.xlu0 %1174  ;;  %v1177_v21 = vpop.permute.xlu1 %1176 }
 0x100   :  { %v1184_v22 = vsel %vm1178_vm6, %v1175_v20, %v1177_v21 }
 0x101   :  { %1905 = vmatmul.mubr.msk.bf16.vlgmr.msra.gmra.mrb[4].mxu0 %vm170_vm1, %v2059_v10 }
 0x102   :  { %1195 = vmatpush1.bf16.msra.mxu0 %v1179_v19  ;;  %1226 = vmatprep.mubr.bf16.mxu0 %v2168_v0 }
 0x103   :  { %v1173_v23 = vpop.permute.xlu0 %1172  ;;  %1280 = vmatprep.subr.bf16.mxu0 %v1184_v22  ;;  %v1171_v24 = vpop.permute.xlu1 %1170 }
 0x104   :  { %v1182_v27 = vsel %vm1178_vm6, %v1171_v24, %v1173_v23  ;;  %v1183_v28 = vsel %vm1178_vm6, %v1173_v23, %v1175_v20  ;;  %v1181_v38 = vsel %vm1178_vm6, %v1169_v13, %v1171_v24  ;;  %v1737_v13 = vunpack.c.h.bf16 %v1735_v5 }
 0x105   :  { %1900 = vmatmul.mubr.msk.bf16.vlgmr.msra.gmra.mrb[4].mxu1 %vm170_vm1, %v2058_v57 }
 0x106   :  { %1059 = vmatpush1.bf16.msra.mxu1 %v1002_v25  ;;  %1090 = vmatprep.mubr.bf16.mxu1 %v2168_v0 }
 0x107   :  { %v1346_v29 = vpop.permute.xlu0 %1345  ;;  %1237 = vmatprep.subr.bf16.mxu1 %v1182_v27  ;;  %v1348_v30 = vpop.permute.xlu1 %1347 }
 0x108   :  { %v1359_v31 = vsel %vm1357_vm7, %v1346_v29, %v1348_v30 }
 0x109   :  { %1907 = vmatmul.mubr.msk.bf16.vlgmr.msra.gmra.mrb[0].mxu0 %vm170_vm1, %v2060_v26 }
 0x10a   :  { %1281 = vmatpush1.bf16.msra.mxu0 %v1183_v28  ;;  %1312 = vmatprep.mubr.bf16.mxu0 %v2168_v0 }
 0x10b   :  { %v1344_v32 = vpop.permute.xlu0 %1343  ;;  %1373 = vmatprep.subr.bf16.mxu0 %v1359_v31  ;;  %v1354_v33 = vpop.permute.xlu1 %1353 }
 0x10c   :  { %v1358_v34 = vsel %vm1357_vm7, %v1344_v32, %v1346_v29  ;;  %v1751_v29 = vrot.slane %v1736_v6, %v1750_v16 }
 0x10f   :  { %v1356_v35 = vpop.permute.xlu0 %1355  ;;  %v1352_v36 = vpop.permute.xlu1 %1351 }
 0x110   :  { %v1363_v37 = vsel %vm1357_vm7, %v1354_v33, %v1356_v35  ;;  %v1362_v43 = vsel %vm1357_vm7, %v1352_v36, %v1354_v33 }
 0x111   :  { %1904 = vmatmul.mubr.msk.bf16.vlgmr.msra.gmra.mrb[4].mxu1 %vm170_vm1, %v2059_v10  ;;  %1909 = vmatmul.mubr.msk.bf16.vlgmr.msra.gmra.mrb[4].mxu0 %vm170_vm1, %v2060_v26 }
 0x112   :  { %1238 = vmatpush1.bf16.msra.mxu1 %v1181_v38  ;;  %1374 = vmatpush1.bf16.msra.mxu0 %v1358_v34 }
 0x113   :  { %v1350_v39 = vpop.permute.xlu0 %1349  ;;  %1405 = vmatprep.mubr.bf16.mxu0 %v2168_v0  ;;  %1459 = vmatprep.subr.bf16.mxu0 %v1363_v37  ;;  %v1525_v40 = vpop.permute.xlu1 %1524 }
 0x114   :  { %1269 = vmatprep.mubr.bf16.mxu1 %v2168_v0  ;;  %v1361_v41 = vsel %vm1357_vm7, %v1350_v39, %v1352_v36  ;;  %v1360_v49 = vsel %vm1357_vm7, %v1348_v30, %v1350_v39  ;;  %v1755_v30 = vrot.slane %v1736_v6, %v1754_v17  ;;  %v1763_v36 = vrot.slane %v1737_v13, %v1746_v7 }
 0x115   :  { %1416 = vmatprep.subr.bf16.mxu1 %v1361_v41 }
 0x117   :  { %v1527_v44 = vpop.permute.xlu0 %1526  ;;  %v1523_v45 = vpop.permute.xlu1 %1522 }
 0x118   :  { %v1538_v46 = vsel %vm1536_vm8, %v1525_v40, %v1527_v44  ;;  %v1537_v51 = vsel %vm1536_vm8, %v1523_v45, %v1525_v40 }
 0x119   :  { %1911 = vmatmul.mubr.msk.bf16.vlgmr.msra.gmra.mrb[0].mxu0 %vm170_vm1, %v2061_v42 }
 0x11a   :  { %1460 = vmatpush1.bf16.msra.mxu0 %v1362_v43  ;;  %1491 = vmatprep.mubr.bf16.mxu0 %v2168_v0 }
 0x11b   :  { %1552 = vmatprep.subr.bf16.mxu0 %v1538_v46  ;;  %v1529_v47 = vpop.permute.xlu0 %1528  ;;  %v1531_v48 = vpop.permute.xlu1 %1530 }
 0x11c   :  { %v1540_v50 = vsel %vm1536_vm8, %v1529_v47, %v1531_v48  ;;  %v1539_v56 = vsel %vm1536_vm8, %v1527_v44, %v1529_v47 }
 0x11d   :  { %1908 = vmatmul.mubr.msk.bf16.vlgmr.msra.gmra.mrb[4].mxu1 %vm170_vm1, %v2060_v26 }
 0x11e   :  { %1417 = vmatpush1.bf16.msra.mxu1 %v1360_v49  ;;  %1448 = vmatprep.mubr.bf16.mxu1 %v2168_v0 }
 0x11f   :  { %v1533_v52 = vpop.permute.xlu0 %1532  ;;  %1595 = vmatprep.subr.bf16.mxu1 %v1540_v50  ;;  %v1535_v53 = vpop.permute.xlu1 %1534 }
 0x120   :  { %v1542_v54 = vsel %vm1536_vm8, %v1533_v52, %v1535_v53  ;;  %v1541_v57 = vsel %vm1536_vm8, %v1531_v48, %v1533_v52 }
 0x121   :  { %1913 = vmatmul.mubr.msk.bf16.vlgmr.msra.gmra.mrb[4].mxu0 %vm170_vm1, %v2061_v42 }
 0x122   :  { %1553 = vmatpush1.bf16.msra.mxu0 %v1537_v51  ;;  %1584 = vmatprep.mubr.bf16.mxu0 %v2168_v0 }
 0x123   :  { %1638 = vmatprep.subr.bf16.mxu0 %v1542_v54 }
 0x129   :  { %1912 = vmatmul.mubr.msk.bf16.vlgmr.msra.gmra.mrb[4].mxu1 %vm170_vm1, %v2061_v42  ;;  %1915 = vmatmul.mubr.msk.bf16.vlgmr.msra.gmra.mrb[0].mxu0 %vm170_vm1, %v2062_v55 }
 0x12a   :  { %1596 = vmatpush1.bf16.msra.mxu1 %v1539_v56  ;;  %1639 = vmatpush1.bf16.msra.mxu0 %v1541_v57 }
 0x12b   :  { %1670 = vmatprep.mubr.bf16.mxu0 %v2168_v0  ;;  %1627 = vmatprep.mubr.bf16.mxu1 %v2168_v0  ;;  %v1742_v0 = vsub.s32 0, %v1741_v4 }
 0x12d   :  { %v1743_v8 = vrot.slane %v1736_v6, %v1742_v0  ;;  %v1777_v12 = vrot.slane %v1747_v9, %v1742_v0  ;;  %v1759_v26 = vrot.slane %v1737_v13, %v1742_v0  ;;  %v1781_v43 = vrot.slane %v1751_v29, %v1742_v0 }
 0x12e   :  { %v1785_v48 = vrot.slane %v1755_v30, %v1742_v0  ;;  %v1793_v51 = vrot.slane %v1763_v36, %v1742_v0 }
 0x12f   :  { %v1773_v10 = vrot.slane %v1743_v8, %v1742_v0  ;;  %v1789_v45 = vrot.slane %v1759_v26, %v1742_v0 }
 0x131   :  { %1917 = vmatmul.mubr.msk.bf16.vlgmr.msra.gmra.mrb[4].mxu0 %vm170_vm1, %v2062_v55 }
 0x135   :  { %1916 = vmatmul.mubr.msk.bf16.vlgmr.msra.gmra.mrb[4].mxu1 %vm170_vm1, %v2062_v55 }
 0x1a8   :  { %v345_v58 = vpop.f32.mrb[0].mxu1 }
 0x1a9   :  { %v347_v59 = vpop.f32.mrb[1].mxu1 }
 0x1aa   :  { %v349_v60 = vpop.f32.mrb[2].mxu1 }
 0x1ab   :  { %v351_v61 = vpop.f32.mrb[3].mxu1 }
 0x1b8   :  { %v431_v62 = vpop.f32.mrb[8].mxu1 }
 0x1b9   :  { %v433_v63 = vpop.f32.mrb[9].mxu1 }
 0x1ba   :  { %v435_v1 = vpop.f32.mrb[10].mxu1 }
 0x1bb   :  { %v437_v2 = vpop.f32.mrb[11].mxu1 }
 0x1fc   :  { %v1586_v11 = vpop.f32.mrb[0].mxu0 }
 0x1fd   :  { %v1930_v14 = vadd.f32 %v1586_v11, %v345_v58  ;;  %v1588_v15 = vpop.f32.mrb[1].mxu0 }
 0x1fe   :  { %v1931_v18 = vadd.f32 %v1588_v15, %v347_v59  ;;  %v1590_v19 = vpop.f32.mrb[2].mxu0 }
 0x1ff   :  { %v1794_v20 = vmul.f32 %v1930_v14, %v1773_v10  ;;  %v1932_v21 = vadd.f32 %v1590_v19, %v349_v60  ;;  %v1592_v22 = vpop.f32.mrb[3].mxu0 }
 0x200   :  { %v1924_v23 = vpack.c.bf16 %v1931_v18, %v1930_v14  ;;  %v1795_v24 = vmul.f32 %v1931_v18, %v1777_v12  ;;  %v1933_v25 = vadd.f32 %v1592_v22, %v351_v61 }
 0x201   :  { %v1820_v27 = vmul.f32 %v1930_v14, %v1794_v20  ;;  %v1800_v28 = vmul.f32 %v1932_v21, %v1773_v10 }
 0x202   :  { %1729 = vst [vmem:[#allocation9] sm:$0xff] %v1924_v23  ;;  %v1806_v31 = vadd.f32 %v1795_v24, %v1794_v20  ;;  %v1821_v32 = vmul.f32 %v1931_v18, %v1795_v24  ;;  %v1927_v33 = vpack.c.bf16 %v1933_v25, %v1932_v21  ;;  %v1801_v34 = vmul.f32 %v1933_v25, %v1777_v12 }
 0x203   :  { %v1826_v35 = vmul.f32 %v1932_v21, %v1800_v28 }
 0x204   :  { %v1832_v37 = vadd.f32 %v1821_v32, %v1820_v27  ;;  %1732 = vst [vmem:[#allocation9 + $0x18] sm:$0xff] %v1927_v33  ;;  %v1813_v38 = vadd.f32 %v1801_v34, %v1800_v28  ;;  %v1827_v39 = vmul.f32 %v1933_v25, %v1801_v34  ;;  %v1672_v40 = vpop.f32.mrb[4].mxu0 }
 0x205   :  { %v1934_v41 = vadd.f32 %v1672_v40, %v431_v62  ;;  %v1674_v42 = vpop.f32.mrb[5].mxu0 }
 0x206   :  { %v1839_v44 = vadd.f32 %v1827_v39, %v1826_v35  ;;  %v1935_v46 = vadd.f32 %v1674_v42, %v433_v63  ;;  %v1676_v47 = vpop.f32.mrb[6].mxu0 }
 0x207   :  { %v1936_v49 = vadd.f32 %v1676_v47, %v435_v1  ;;  %v1678_v50 = vpop.f32.mrb[7].mxu0  ;;  %v1798_v57 = vmul.f32 %v1934_v41, %v1789_v45 }
 0x208   :  { %v1926_v52 = vpack.c.bf16 %v1935_v46, %v1934_v41  ;;  %v1937_v53 = vadd.f32 %v1678_v50, %v437_v2  ;;  %v1629_v54 = vpop.f32.mrb[4].mxu1  ;;  %v1799_v5 = vmul.f32 %v1935_v46, %v1793_v51 }
 0x209   :  { %v1796_v55 = vmul.f32 %v1781_v43, %v1629_v54  ;;  %v1631_v56 = vpop.f32.mrb[5].mxu1  ;;  %v1804_v6 = vmul.f32 %v1936_v49, %v1789_v45  ;;  %v1824_v11 = vmul.f32 %v1934_v41, %v1798_v57 }
 0x20a   :  { %1731 = vst [vmem:[#allocation9 + $0x10] sm:$0xff] %v1926_v52  ;;  %v1929_v58 = vpack.c.bf16 %v1937_v53, %v1936_v49  ;;  %v1925_v59 = vpack.c.bf16 %v1631_v56, %v1629_v54  ;;  %v1797_v60 = vmul.f32 %v1785_v48, %v1631_v56  ;;  %v1633_v61 = vpop.f32.mrb[6].mxu1  ;;  %v1805_v13 = vmul.f32 %v1937_v53, %v1793_v51 }
 0x20b   :  { %v1807_v62 = vadd.f32 %v1806_v31, %v1796_v55  ;;  %v1822_v3 = vmul.f32 %v1796_v55, %v1629_v54  ;;  %v1802_v4 = vmul.f32 %v1781_v43, %v1633_v61  ;;  %v1635_v63 = vpop.f32.mrb[7].mxu1  ;;  %v1830_v18 = vmul.f32 %v1936_v49, %v1804_v6 }
 0x20c   :  { %1734 = vst [vmem:[#allocation9 + $0x28] sm:$0xff] %v1929_v58  ;;  %1730 = vst [vmem:[#allocation9 + $0x8] sm:$0xff] %v1925_v59  ;;  %v1823_v1 = vmul.f32 %v1797_v60, %v1631_v56  ;;  %v1928_v0 = vpack.c.bf16 %v1635_v63, %v1633_v61  ;;  %v1803_v2 = vmul.f32 %v1785_v48, %v1635_v63 }
 0x20d   :  { %v1833_v7 = vadd.f32 %v1832_v37, %v1822_v3  ;;  %v1814_v8 = vadd.f32 %v1813_v38, %v1802_v4  ;;  %v1828_v9 = vmul.f32 %v1802_v4, %v1633_v61  ;;  %v1808_v10 = vadd.f32 %v1807_v62, %v1797_v60 }
 0x20e   :  { %1733 = vst [vmem:[#allocation9 + $0x20] sm:$0xff] %v1928_v0  ;;  %v1829_v12 = vmul.f32 %v1803_v2, %v1635_v63  ;;  %v1825_v19 = vmul.f32 %v1935_v46, %v1799_v5  ;;  %v1831_v26 = vmul.f32 %v1937_v53, %v1805_v13 }
 0x20f   :  { %v1840_v14 = vadd.f32 %v1839_v44, %v1828_v9  ;;  %v1815_v15 = vadd.f32 %v1814_v8, %v1803_v2  ;;  %v1809_v16 = vadd.f32 %v1808_v10, %v1798_v57  ;;  %v1834_v17 = vadd.f32 %v1833_v7, %v1823_v1 }
 0x211   :  { %v1841_v20 = vadd.f32 %v1840_v14, %v1829_v12  ;;  %v1810_v21 = vadd.f32 %v1809_v16, %v1799_v5  ;;  %v1816_v22 = vadd.f32 %v1815_v15, %v1804_v6  ;;  %v1835_v23 = vadd.f32 %v1834_v17, %v1824_v11 }
 0x213   :  { %1811 = vadd.xlane.f32.xlu0 %v1810_v21  ;;  %v1817_v24 = vadd.f32 %v1816_v22, %v1805_v13  ;;  %v1836_v25 = vadd.f32 %v1835_v23, %v1825_v19  ;;  %v1842_v27 = vadd.f32 %v1841_v20, %v1830_v18 }
 0x215   :  { %1818 = vadd.xlane.f32.xlu1 %v1817_v24  ;;  %v1843_v28 = vadd.f32 %v1842_v27, %v1831_v26 }
 0x217   :  { %1837 = vadd.xlane.f32.xlu0 %v1836_v25 }
 0x21b   :  { %1844 = vadd.xlane.f32.xlu0 %v1843_v28 }
 0x21c   :  { %2143 = shalt.err (!%p2140_p6)
}
 0x21d   :  { %s2144_s26 = scalar_lea.hbm %s2468_s4, 768 }
 0x21e   :  { %p2145_p7 = scmp.ne.s32.totalorder %s2468_s4, %s2144_s26  ;;  %p2148_p8 = scmp.lt.u32.totalorder %s2144_s26, %s2468_s4 }
 0x220   :  { %p2150_p9 = pnand %p2148_p8, %p2145_p7 }
 0x222   :  { %2153 = shalt.err (!%p2150_p9)
}
 0x223   :  { %1863 = dma.vmem_to_hbm [thread:$0]  %s1858_s21, 768, %s2468_s4, [#allocation5], %s2165_s22, %s2165_s22, %s2166_s23   ;;  %vm1846_vm9 = vcmask 7168   ;;  %vm1849_vm10 = vcmask 15360  }
 0x2a0   :  { %v1812_v29 = vpop.xlane.xlu0 %1811 }
 0x2a2   :  { %v1819_v32 = vpop.xlane.xlu1 %1818 }
 0x2a4   :  { %v1838_v30 = vpop.xlane.xlu0 %1837 }
 0x2a5   :  { %v1847_v31 = vsel %vm1846_vm9, %v1812_v29, %v1838_v30 }
 0x2a6   :  { %1850 = vst.msk [vmem:[%s2469_s5] sm:$0xff] %vm1849_vm10, %v1847_v31 }
 0x2a8   :  { %v1845_v33 = vpop.xlane.xlu0 %1844 }
 0x2a9   :  { %v1848_v34 = vsel %vm1846_vm9, %v1819_v32, %v1845_v33 }
 0x2aa   :  { %1851 = vst.msk [vmem:[%s2469_s5 + $0x8] sm:$0xff] %vm1849_vm10, %v1848_v34 }
 0x2ab   :  { %2158 = dma.done.wait [#allocation5], 768  }
 0x2ac   :  { %2159 = vsyncadd [#allocation5], 4294966528 }
 0x2ad   :  { %1871 = vsyncpa [#allocation4], 1 }
 0x2ae   :  { %1872 = vsyncpa [#allocation7], 1 }
 0x2af   :  { %1873 = vsyncpa [#allocation5], 1 }

</bundles_post_ra>
